<compile_context>
chip_gen: v7x
topology: tpu7x:2x2x1
jax: 0.10.0
libtpu: 0.0.40
codegen_flags: <defaults>
</compile_context>

<pallas_src>
import jax
import jax.numpy as jnp
from jax.experimental import pallas as pl
from jax.experimental.pallas import tpu as pltpu


# ----------------------------------------------------------------------------
# Hardware queries / tile selection
# ----------------------------------------------------------------------------
def _vmem_capacity_bytes():
    try:
        info = pltpu.get_tpu_info()
        for attr in ("vmem_capacity_bytes", "vmem_bytes", "vmem_size_bytes"):
            v = getattr(info, attr, None)
            if v:
                return int(v)
    except Exception:
        pass
    return 64 * 1024 * 1024          # conservative (v7x-sized) default


def _vmem_budget_bytes():
    return (_vmem_capacity_bytes() * 3) // 4


def _allow_wide_row_tile():
    # v6e / v7x MXUs are 256-wide; keep tq <= 128 on older generations.
    try:
        kind = jax.devices()[0].device_kind.lower()
        return not any(t in kind for t in ("v2", "v3", "v4", "v5"))
    except Exception:
        return True


def _pick_row_tile(bsz, n_views, d):
    """Pick (tq, padded_bsz): tq divides padded_bsz, is 8-aligned, fits VMEM."""
    budget = _vmem_budget_bytes()
    cands = (256, 128, 64, 32, 16, 8) if _allow_wide_row_tile() else (128, 64, 32, 16, 8)

    def fits(tq, bsz_p):
        n = bsz_p * n_views
        est = (2 * n * d * 2                    # resident bf16 features (x2 bufs)
               + 2 * tq * d * 2                 # streamed anchor block (x2 bufs)
               + 10 * tq * n * 4                # in-kernel [tq, N] temporaries
               + 2 * tq * max(bsz_p, 128) * 4   # scale row-block (x2 bufs)
               + 8 * tq * 512                   # (tq, 1) outputs
               + 4 * bsz_p * 512)               # resident label vectors
        return est <= budget

    for c in cands:                              # prefer a tile needing no padding
        if bsz % c == 0 and fits(c, bsz):
            return c, bsz
    bsz_p = ((bsz + 7) // 8) * 8                 # pad the batch to a multiple of 8
    for c in cands:
        if bsz_p % c == 0 and fits(c, bsz_p):
            return c, bsz_p
    return 8, bsz_p


# ----------------------------------------------------------------------------
# Row L2-normalization kernel (F.normalize(dim=-1), eps=1e-12) -> bf16
# ----------------------------------------------------------------------------
def _normalize_kernel(x_ref, o_ref):
    x = x_ref[...]
    ssq = jnp.sum(x * x, axis=1, keepdims=True)
    o_ref[...] = (x * jax.lax.rsqrt(jnp.maximum(ssq, 1e-24))).astype(o_ref.dtype)


def _normalize_rows(x):
    n, d = x.shape
    budget = _vmem_budget_bytes()
    nt = 8
    for c in (1024, 512, 256, 128, 64, 32, 16, 8):   # big tiles -> HBM roofline
        if n % c == 0 and c * d * 12 <= budget:
            nt = c
            break
    return pl.pallas_call(
        _normalize_kernel,
        out_shape=jax.ShapeDtypeStruct((n, d), jnp.bfloat16),
        grid=(n // nt,),
        in_specs=[pl.BlockSpec((nt, d), lambda i: (i, 0))],
        out_specs=pl.BlockSpec((nt, d), lambda i: (i, 0)),
        compiler_params=pltpu.CompilerParams(
            dimension_semantics=("parallel",),
            vmem_limit_bytes=_vmem_budget_bytes()),
    )(x)


# ----------------------------------------------------------------------------
# Fused SupCon kernel: per-row-block logits, in-kernel masks, two losses at once
# ----------------------------------------------------------------------------
def _make_supcon_kernel(temperature, base_temperature, n_views, bsz_p,
                        has_scale, has_pad):
    inv_temp = 1.0 / temperature
    neg_scale = -(temperature / base_temperature)

    def kernel(*refs):
        it = iter(refs)
        featn_ref = next(it)       # [N, D]  bf16, resident contrast features
        anchor_ref = next(it)      # [tq, D] bf16, streamed anchor rows
        labs_r_ref = next(it)      # [bsz_p, 1] f32, resident
        labs_c_ref = next(it)      # [1, bsz_p] f32, resident
        valid_c_ref = next(it) if has_pad else None
        scale_ref = next(it) if has_scale else None
        loss1_ref = next(it)       # [tq, 1] label-mask loss
        loss2_ref = next(it)       # [tq, 1] eye-mask  loss

        tq = loss1_ref.shape[0]
        n = featn_ref.shape[0]
        qi = pl.program_id(0)
        row0 = pl.multiple_of(qi * tq, tq)         # first anchor row (global)
        r0s = pl.multiple_of(row0 % bsz_p, tq)     # its sample index (per view)

        def tile_views(x):
            return x if n_views == 1 else jnp.tile(x, (1, n_views))

        # anchor @ contrast.T on the MXU: bf16 operands, f32 accumulation.
        s = jax.lax.dot_general(
            anchor_ref[...], featn_ref[...], (((1,), (1,)), ((), ())),
            preferred_element_type=jnp.float32) * inv_temp            # [tq, N]

        # NOTE: matches the reference ordering exactly -- the max is taken over
        # the *unscaled* similarities and the phenotype scale is applied after
        # the max subtraction (SupConLoss applies scale to logits - logits_max).
        logits = s - jnp.max(s, axis=1, keepdims=True)                # [tq, N]
        if has_scale:
            logits = logits * tile_views(scale_ref[...])              # [tq, N]

        col_idx = jax.lax.broadcasted_iota(jnp.int32, (tq, n), 1)
        row_idx = jax.lax.broadcasted_iota(jnp.int32, (tq, n), 0) + row0
        lmask = row_idx != col_idx                                    # no self-contrast
        if has_pad:
            lmask = jnp.logical_and(lmask,
                                    tile_views(valid_c_ref[...]) > 0.5)

        lab_r = labs_r_ref[pl.ds(r0s, tq), :]                         # [tq, 1]
        lab_c = tile_views(labs_c_ref[...])                           # [1, N]
        samp_r = jax.lax.broadcasted_iota(jnp.int32, (tq, 1), 0) + r0s
        samp_c = tile_views(
            jax.lax.broadcasted_iota(jnp.int32, (1, bsz_p), 1))       # [1, N]

        mask_lab = jnp.logical_and(lab_r == lab_c, lmask)             # label positives
        mask_eye = jnp.logical_and(samp_r == samp_c, lmask)           # other-view positives

        exp_logits = jnp.where(lmask, jnp.exp(logits), 0.0)
        log_denom = jnp.log(jnp.sum(exp_logits, axis=1, keepdims=True))  # [tq, 1]

        def per_row_loss(mask):
            pos = jnp.sum(jnp.where(mask, logits, 0.0), axis=1, keepdims=True)
            cnt = jnp.sum(jnp.where(mask, 1.0, 0.0), axis=1, keepdims=True)
            safe = jnp.where(cnt < 1e-6, 1.0, cnt)
            # mean log-prob of positives without materializing log_prob [tq, N]
            return neg_scale * (pos - cnt * log_denom) / safe

        # TODO(synk): emit lane-dense (1, tq) loss blocks once a cheap
        # sublane->lane relayout is validated; (tq, 1) blocks are tiny anyway.
        loss1_ref[...] = per_row_loss(mask_lab)
        loss2_ref[...] = per_row_loss(mask_eye)

    return kernel


def _supcon_row_losses(featn, labs, bsz, bsz_p, n_views, tq, scale_b,
                       temperature, base_temperature):
    """Per-anchor-row losses for (label mask, eye mask); shapes [N, 1]."""
    n, d = featn.shape
    nb = bsz_p // tq
    has_scale = scale_b is not None
    has_pad = bsz_p != bsz

    labs = labs.astype(jnp.float32)
    args = [featn, featn, labs.reshape(bsz_p, 1), labs.reshape(1, bsz_p)]
    in_specs = [
        pl.BlockSpec((n, d), lambda qi: (0, 0)),          # contrast (resident)
        pl.BlockSpec((tq, d), lambda qi: (qi, 0)),        # anchor rows (streamed)
        pl.BlockSpec((bsz_p, 1), lambda qi: (0, 0)),      # labels, column form
        pl.BlockSpec((1, bsz_p), lambda qi: (0, 0)),      # labels, row form
    ]
    if has_pad:
        valid_c = (jnp.arange(bsz_p) < bsz).astype(jnp.float32).reshape(1, bsz_p)
        args.append(valid_c)
        in_specs.append(pl.BlockSpec((1, bsz_p), lambda qi: (0, 0)))
    if has_scale:
        args.append(scale_b.astype(jnp.float32))
        in_specs.append(pl.BlockSpec((tq, bsz_p), lambda qi: (qi % nb, 0)))

    kernel = _make_supcon_kernel(temperature, base_temperature, n_views, bsz_p,
                                 has_scale, has_pad)
    loss1, loss2 = pl.pallas_call(
        kernel,
        out_shape=(jax.ShapeDtypeStruct((n, 1), jnp.float32),
                   jax.ShapeDtypeStruct((n, 1), jnp.float32)),
        grid=(n // tq,),
        in_specs=in_specs,
        out_specs=(pl.BlockSpec((tq, 1), lambda qi: (qi, 0)),
                   pl.BlockSpec((tq, 1), lambda qi: (qi, 0))),
        compiler_params=pltpu.CompilerParams(
            dimension_semantics=("parallel",),
            vmem_limit_bytes=_vmem_budget_bytes()),
    )(*args)
    return loss1, loss2


# ----------------------------------------------------------------------------
# Fused phenotype-similarity kernel (categorical + continuous + alpha rescale)
# ----------------------------------------------------------------------------
def _make_phenotype_kernel(alpha, has_cat, has_cont):
    inv_alpha = 1.0 / alpha

    def rescale(s):
        s = jnp.where(s > 1.0, s * alpha, s)
        return jnp.where(s < 1.0, s * inv_alpha, s)

    def kernel(*refs):
        it = iter(refs)
        cat_ref = next(it) if has_cat else None
        catT_ref = next(it) if has_cat else None
        cont_ref = next(it) if has_cont else None
        contT_ref = next(it) if has_cont else None
        sim_ref = next(it)

        b = sim_ref.shape[0]
        inv_b = 1.0 / b
        out = jnp.ones((b, b), jnp.float32)

        if has_cat:
            cat = cat_ref[...]                           # [B, Fc]
            catT = catT_ref[...]                         # [Fc, B]
            f = cat.shape[1]
            valid = (cat != -1.0).astype(jnp.float32)
            cnt = jnp.sum(valid, axis=0, keepdims=True)              # [1, F]
            conf = jnp.where(cnt > 1.0, cnt * inv_b, 0.0)            # [1, F]
            lane_f = jax.lax.broadcasted_iota(jnp.int32, (1, f), 1)
            sub_f = jax.lax.broadcasted_iota(jnp.int32, (f, 1), 0)

            def cat_body(k, sim):
                colv = jnp.sum(jnp.where(lane_f == k, cat, 0.0),
                               axis=1, keepdims=True)                # [B, 1]
                rowv = jnp.sum(jnp.where(sub_f == k, catT, 0.0),
                               axis=0, keepdims=True)                # [1, B]
                c_k = jnp.sum(jnp.where(lane_f == k, conf, 0.0),
                              axis=1, keepdims=True)                 # [1, 1]
                pair = jnp.logical_and(
                    jnp.logical_and(colv != -1.0, rowv != -1.0), colv == rowv)
                return sim + jnp.where(pair, c_k, 0.0)

            sim_cat = jax.lax.fori_loop(0, f, cat_body,
                                        jnp.ones((b, b), jnp.float32),
                                        unroll=(f <= 8))
            out = out * rescale(sim_cat * (1.0 / f))

        if has_cont:
            cont = cont_ref[...]                         # [B, Fn]
            contT = contT_ref[...]                       # [Fn, B]
            f = cont.shape[1]
            validb = cont != -1.0
            cnt = jnp.sum(validb.astype(jnp.float32), axis=0, keepdims=True)
            conf = jnp.where(cnt > 1.0, cnt * inv_b, 0.0)
            safe_cnt = jnp.maximum(cnt, 1.0)
            mean = jnp.sum(jnp.where(validb, cont, 0.0), axis=0,
                           keepdims=True) / safe_cnt
            # torch.std is unbiased (ddof = 1)
            var = jnp.sum(jnp.where(validb, (cont - mean) ** 2, 0.0), axis=0,
                          keepdims=True) / jnp.maximum(cnt - 1.0, 1.0)
            inv_std = 1.0 / (jnp.sqrt(var) + 1e-6)
            lane_f = jax.lax.broadcasted_iota(jnp.int32, (1, f), 1)
            sub_f = jax.lax.broadcasted_iota(jnp.int32, (f, 1), 0)
            row_i = jax.lax.broadcasted_iota(jnp.int32, (b, b), 0)
            col_i = jax.lax.broadcasted_iota(jnp.int32, (b, b), 1)
            off_diag = row_i != col_i

            def cont_body(k, sim):
                colv = jnp.sum(jnp.where(lane_f == k, cont, 0.0),
                               axis=1, keepdims=True)
                rowv = jnp.sum(jnp.where(sub_f == k, contT, 0.0),
                               axis=0, keepdims=True)
                m_k = jnp.sum(jnp.where(lane_f == k, mean, 0.0),
                              axis=1, keepdims=True)
                is_k = jnp.sum(jnp.where(lane_f == k, inv_std, 0.0),
                               axis=1, keepdims=True)
                c_k = jnp.sum(jnp.where(lane_f == k, conf, 0.0),
                              axis=1, keepdims=True)
                ncol = (colv - m_k) * is_k
                nrow = (rowv - m_k) * is_k
                pair = jnp.logical_and(colv != -1.0, rowv != -1.0)
                dist = jnp.where(jnp.logical_and(pair, off_diag),
                                 (ncol - nrow) ** 2, 0.0)
                return sim + jnp.exp(dist * -0.5) * c_k              # sigma = 1.0

            sim_cont = jax.lax.fori_loop(0, f, cont_body,
                                         jnp.ones((b, b), jnp.float32),
                                         unroll=(f <= 8))
            out = out * rescale(sim_cont * (1.0 / f))

        sim_ref[...] = out

    return kernel


# ----------------------------------------------------------------------------
# Module-level wrapper mirroring TaskOrientedPhenotypeLearning.forward
# ----------------------------------------------------------------------------
class TaskOrientedPhenotypeLearningPallas:
    def __init__(self, world_size, batch_size, temperature=0.1, alpha=5.0):
        self.world_size = world_size
        self.batch_size = batch_size
        self.temperature = temperature
        self.base_temperature = 0.07   # SupConLoss default
        self.alpha = alpha

    def compute_scale_factors(self, cat_phenotypes=None, cont_phenotypes=None):
        if cat_phenotypes is None and cont_phenotypes is None:
            return None
        has_cat = cat_phenotypes is not None
        has_cont = cont_phenotypes is not None
        bs = (cat_phenotypes.shape[0] if has_cat else cont_phenotypes.shape[0])

        args, in_specs = [], []
        if has_cat:
            cat = cat_phenotypes.astype(jnp.float32)
            catT = jnp.transpose(cat)
            args += [cat, catT]
            in_specs += [pl.BlockSpec(cat.shape, lambda i: (0, 0)),
                         pl.BlockSpec(catT.shape, lambda i: (0, 0))]
        if has_cont:
            cont = cont_phenotypes.astype(jnp.float32)
            contT = jnp.transpose(cont)
            args += [cont, contT]
            in_specs += [pl.BlockSpec(cont.shape, lambda i: (0, 0)),
                         pl.BlockSpec(contT.shape, lambda i: (0, 0))]

        kernel = _make_phenotype_kernel(self.alpha, has_cat, has_cont)
        return pl.pallas_call(
            kernel,
            out_shape=jax.ShapeDtypeStruct((bs, bs), jnp.float32),
            grid=(1,),
            in_specs=in_specs,
            out_specs=pl.BlockSpec((bs, bs), lambda i: (0, 0)),
        )(*args)

    def __call__(self, features, labels=None, cat_phenotypes=None,
                 cont_phenotypes=None):
        # TODO(synk): world_size > 1 path (GatherLayer cross-device all-gather)
        # not implemented; single-device semantics only.
        scale_b = self.compute_scale_factors(cat_phenotypes, cont_phenotypes)

        bsz, n_views, d = features.shape
        tq, bsz_p = _pick_row_tile(bsz, n_views, d)
        pad = bsz_p - bsz
        n = bsz_p * n_views

        feats = features.astype(jnp.float32)
        if pad:
            feats = jnp.pad(feats, ((0, pad), (0, 0), (0, 0)))
            if scale_b is not None:
                scale_b = jnp.pad(scale_b, ((0, pad), (0, pad)),
                                  constant_values=1.0)

        # contrast_feature = cat(unbind(features, dim=1), dim=0)  -> view-major
        contrast = jnp.transpose(feats, (1, 0, 2)).reshape(n, d)
        featn = _normalize_rows(contrast)                       # bf16 [N, D]

        if labels is not None:
            labs = labels.astype(jnp.float32).reshape(-1)
            if pad:
                labs = jnp.concatenate(
                    [labs, jnp.full((pad,), jnp.nan, jnp.float32)])
        else:
            labs = jnp.arange(bsz_p, dtype=jnp.float32)   # loss1 unused then

        loss_lab, loss_eye = _supcon_row_losses(
            featn, labs, bsz, bsz_p, n_views, tq, scale_b,
            self.temperature, self.base_temperature)

        denom = float(n_views * bsz)
        if pad:
            rv = ((jnp.arange(n) % bsz_p) < bsz).reshape(n, 1)
            mean_lab = jnp.sum(jnp.where(rv, loss_lab, 0.0)) / denom
            mean_eye = jnp.sum(jnp.where(rv, loss_eye, 0.0)) / denom
        else:
            mean_lab = jnp.mean(loss_lab)
            mean_eye = jnp.mean(loss_eye)

        if labels is not None:
            return mean_lab + mean_eye    # SupCon(labels) + SupCon(eye)
        return mean_eye                   # SimCLR-style path


if __name__ == "__main__":
    key = jax.random.PRNGKey(0)
    k1, k2, k3, k4, k5, k6, k7 = jax.random.split(key, 7)

    bsz, n_views, d = 8, 2, 128
    features = jax.random.normal(k1, (bsz, n_views, d), jnp.float32)
    labels = jax.random.randint(k2, (bsz,), 0, 3)
    # categorical phenotypes: values in {-1 (missing), 0, 1, 2}
    cat_phenotypes = jax.random.randint(k3, (bsz, 3), -1, 3).astype(jnp.float32)
    # continuous phenotypes with some missing (-1) entries
    cont_vals = jax.random.normal(k4, (bsz, 2), jnp.float32)
    miss = jax.random.bernoulli(k5, 0.25, (bsz, 2))
    cont_phenotypes = jnp.where(miss, -1.0, cont_vals)

    module = TaskOrientedPhenotypeLearningPallas(world_size=1, batch_size=bsz,
                                                 temperature=0.1, alpha=5.0)
    # labelled + phenotype path (scale factors, fused dual-mask SupCon)
    loss = module(features, labels, cat_phenotypes, cont_phenotypes)
    jax.block_until_ready(loss)

    # unlabeled / no-phenotype (SimCLR-style) path (no scale input compiled in)
    loss_unsup = module(features)
    jax.block_until_ready(loss_unsup)

    # odd batch size -> padded path (no phenotypes)
    bsz2 = 6
    feats2 = jax.random.normal(k6, (bsz2, 2, 64), jnp.float32)
    labels2 = jax.random.randint(k7, (bsz2,), 0, 2)
    loss_pad = module(feats2, labels2)
    jax.block_until_ready(loss_pad)

    print("KERNEL_OK")
</pallas_src>

<mosaic_0001>
module attributes {stable_mosaic.version = 11 : i64} {
  func.func @kernel(%arg0: i32, %arg1: memref<8x3xf32, #tpu.memory_space<vmem>>, %arg2: memref<3x8xf32, #tpu.memory_space<vmem>>, %arg3: memref<8x2xf32, #tpu.memory_space<vmem>>, %arg4: memref<2x8xf32, #tpu.memory_space<vmem>>, %arg5: memref<8x8xf32, #tpu.memory_space<vmem>>) attributes {dimension_semantics = [#tpu.dimension_semantics<arbitrary>], iteration_bounds = array<i64: 1>, scalar_prefetch = 0 : i64, scratch_operands = 0 : i64, tpu.core_type = #tpu.core_type<tc>, window_params = [{pipeline_mode = #tpu.pipeline_mode<synchronous>, transform_indices = @transform_0, window_bounds = array<i64: 8, 3>}, {pipeline_mode = #tpu.pipeline_mode<synchronous>, transform_indices = @transform_1, window_bounds = array<i64: 3, 8>}, {pipeline_mode = #tpu.pipeline_mode<synchronous>, transform_indices = @transform_2, window_bounds = array<i64: 8, 2>}, {pipeline_mode = #tpu.pipeline_mode<synchronous>, transform_indices = @transform_3, window_bounds = array<i64: 2, 8>}, {pipeline_mode = #tpu.pipeline_mode<synchronous>, transform_indices = @transform_4, window_bounds = array<i64: 8, 8>}]} {
    %cst = arith.constant 1.000000e+00 : f32
    %0 = vector.broadcast %cst : f32 to vector<8x8xf32>
    %c0 = arith.constant 0 : index
    %c0_0 = arith.constant 0 : index
    %1 = vector.load %arg1[%c0, %c0_0] : memref<8x3xf32, #tpu.memory_space<vmem>>, vector<8x3xf32>
    %c0_1 = arith.constant 0 : index
    %c0_2 = arith.constant 0 : index
    %2 = vector.load %arg2[%c0_1, %c0_2] : memref<3x8xf32, #tpu.memory_space<vmem>>, vector<3x8xf32>
    %cst_3 = arith.constant -1.000000e+00 : f32
    %3 = vector.broadcast %cst_3 : f32 to vector<8x3xf32>
    %4 = arith.cmpf one, %1, %3 : vector<8x3xf32>
    %5 = arith.extui %4 : vector<8x3xi1> to vector<8x3xi32>
    %6 = arith.sitofp %5 : vector<8x3xi32> to vector<8x3xf32>
    %cst_4 = arith.constant dense<0.000000e+00> : vector<3xf32>
    %7 = vector.multi_reduction <add>, %6, %cst_4 [0] : vector<8x3xf32> to vector<3xf32>
    %8 = vector.shape_cast %7 : vector<3xf32> to vector<1x3xf32>
    %cst_5 = arith.constant 1.000000e+00 : f32
    %9 = vector.broadcast %cst_5 : f32 to vector<1x3xf32>
    %10 = arith.cmpf ogt, %8, %9 : vector<1x3xf32>
    %cst_6 = arith.constant 1.250000e-01 : f32
    %11 = vector.broadcast %cst_6 : f32 to vector<1x3xf32>
    %12 = arith.mulf %8, %11 : vector<1x3xf32>
    %cst_7 = arith.constant 0.000000e+00 : f32
    %13 = vector.broadcast %cst_7 : f32 to vector<1x3xf32>
    %14 = arith.select %10, %12, %13 : vector<1x3xi1>, vector<1x3xf32>
    %15 = tpu.iota {dimensions = array<i32: 1>} : vector<1x3xi32>
    %16 = tpu.iota {dimensions = array<i32: 0>} : vector<3x1xi32>
    %cst_8 = arith.constant 1.000000e+00 : f32
    %17 = vector.broadcast %cst_8 : f32 to vector<8x8xf32>
    %c0_i32 = arith.constant 0 : i32
    %18 = vector.broadcast %c0_i32 : i32 to vector<1x3xi32>
    %19 = arith.cmpi eq, %15, %18 : vector<1x3xi32>
    %cst_9 = arith.constant 0.000000e+00 : f32
    %20 = vector.shape_cast %19 : vector<1x3xi1> to vector<1x3xi1>
    %21 = vector.broadcast %20 : vector<1x3xi1> to vector<8x3xi1>
    %22 = vector.broadcast %cst_9 : f32 to vector<8x3xf32>
    %23 = arith.select %21, %1, %22 : vector<8x3xi1>, vector<8x3xf32>
    %cst_10 = arith.constant dense<0.000000e+00> : vector<8xf32>
    %24 = vector.multi_reduction <add>, %23, %cst_10 [1] : vector<8x3xf32> to vector<8xf32>
    %25 = vector.shape_cast %24 : vector<8xf32> to vector<8x1xf32>
    %26 = vector.broadcast %c0_i32 : i32 to vector<3x1xi32>
    %27 = arith.cmpi eq, %16, %26 : vector<3x1xi32>
    %cst_11 = arith.constant 0.000000e+00 : f32
    %28 = vector.shape_cast %27 : vector<3x1xi1> to vector<3x1xi1>
    %29 = vector.broadcast %28 : vector<3x1xi1> to vector<3x8xi1>
    %30 = vector.broadcast %cst_11 : f32 to vector<3x8xf32>
    %31 = arith.select %29, %2, %30 : vector<3x8xi1>, vector<3x8xf32>
    %cst_12 = arith.constant dense<0.000000e+00> : vector<8xf32>
    %32 = vector.multi_reduction <add>, %31, %cst_12 [0] : vector<3x8xf32> to vector<8xf32>
    %33 = vector.shape_cast %32 : vector<8xf32> to vector<1x8xf32>
    %34 = vector.broadcast %c0_i32 : i32 to vector<1x3xi32>
    %35 = arith.cmpi eq, %15, %34 : vector<1x3xi32>
    %cst_13 = arith.constant 0.000000e+00 : f32
    %36 = vector.broadcast %cst_13 : f32 to vector<1x3xf32>
    %37 = arith.select %35, %14, %36 : vector<1x3xi1>, vector<1x3xf32>
    %cst_14 = arith.constant dense<0.000000e+00> : vector<1xf32>
    %38 = vector.multi_reduction <add>, %37, %cst_14 [1] : vector<1x3xf32> to vector<1xf32>
    %39 = vector.shape_cast %38 : vector<1xf32> to vector<1x1xf32>
    %cst_15 = arith.constant -1.000000e+00 : f32
    %40 = vector.broadcast %cst_15 : f32 to vector<8x1xf32>
    %41 = arith.cmpf one, %25, %40 : vector<8x1xf32>
    %cst_16 = arith.constant -1.000000e+00 : f32
    %42 = vector.broadcast %cst_16 : f32 to vector<1x8xf32>
    %43 = arith.cmpf one, %33, %42 : vector<1x8xf32>
    %44 = vector.broadcast %41 : vector<8x1xi1> to vector<8x8xi1>
    %45 = vector.broadcast %43 : vector<1x8xi1> to vector<8x8xi1>
    %46 = arith.andi %44, %45 : vector<8x8xi1>
    %47 = vector.broadcast %25 : vector<8x1xf32> to vector<8x8xf32>
    %48 = vector.broadcast %33 : vector<1x8xf32> to vector<8x8xf32>
    %49 = arith.cmpf oeq, %47, %48 : vector<8x8xf32>
    %50 = arith.andi %46, %49 : vector<8x8xi1>
    %cst_17 = arith.constant 0.000000e+00 : f32
    %51 = vector.shape_cast %39 : vector<1x1xf32> to vector<1x1xf32>
    %52 = vector.broadcast %51 : vector<1x1xf32> to vector<8x8xf32>
    %53 = vector.broadcast %cst_17 : f32 to vector<8x8xf32>
    %54 = arith.select %50, %52, %53 : vector<8x8xi1>, vector<8x8xf32>
    %55 = arith.addf %17, %54 : vector<8x8xf32>
    %c1_i32 = arith.constant 1 : i32
    %56 = vector.broadcast %c1_i32 : i32 to vector<1x3xi32>
    %57 = arith.cmpi eq, %15, %56 : vector<1x3xi32>
    %cst_18 = arith.constant 0.000000e+00 : f32
    %58 = vector.shape_cast %57 : vector<1x3xi1> to vector<1x3xi1>
    %59 = vector.broadcast %58 : vector<1x3xi1> to vector<8x3xi1>
    %60 = vector.broadcast %cst_18 : f32 to vector<8x3xf32>
    %61 = arith.select %59, %1, %60 : vector<8x3xi1>, vector<8x3xf32>
    %cst_19 = arith.constant dense<0.000000e+00> : vector<8xf32>
    %62 = vector.multi_reduction <add>, %61, %cst_19 [1] : vector<8x3xf32> to vector<8xf32>
    %63 = vector.shape_cast %62 : vector<8xf32> to vector<8x1xf32>
    %64 = vector.broadcast %c1_i32 : i32 to vector<3x1xi32>
    %65 = arith.cmpi eq, %16, %64 : vector<3x1xi32>
    %cst_20 = arith.constant 0.000000e+00 : f32
    %66 = vector.shape_cast %65 : vector<3x1xi1> to vector<3x1xi1>
    %67 = vector.broadcast %66 : vector<3x1xi1> to vector<3x8xi1>
    %68 = vector.broadcast %cst_20 : f32 to vector<3x8xf32>
    %69 = arith.select %67, %2, %68 : vector<3x8xi1>, vector<3x8xf32>
    %cst_21 = arith.constant dense<0.000000e+00> : vector<8xf32>
    %70 = vector.multi_reduction <add>, %69, %cst_21 [0] : vector<3x8xf32> to vector<8xf32>
    %71 = vector.shape_cast %70 : vector<8xf32> to vector<1x8xf32>
    %72 = vector.broadcast %c1_i32 : i32 to vector<1x3xi32>
    %73 = arith.cmpi eq, %15, %72 : vector<1x3xi32>
    %cst_22 = arith.constant 0.000000e+00 : f32
    %74 = vector.broadcast %cst_22 : f32 to vector<1x3xf32>
    %75 = arith.select %73, %14, %74 : vector<1x3xi1>, vector<1x3xf32>
    %cst_23 = arith.constant dense<0.000000e+00> : vector<1xf32>
    %76 = vector.multi_reduction <add>, %75, %cst_23 [1] : vector<1x3xf32> to vector<1xf32>
    %77 = vector.shape_cast %76 : vector<1xf32> to vector<1x1xf32>
    %cst_24 = arith.constant -1.000000e+00 : f32
    %78 = vector.broadcast %cst_24 : f32 to vector<8x1xf32>
    %79 = arith.cmpf one, %63, %78 : vector<8x1xf32>
    %cst_25 = arith.constant -1.000000e+00 : f32
    %80 = vector.broadcast %cst_25 : f32 to vector<1x8xf32>
    %81 = arith.cmpf one, %71, %80 : vector<1x8xf32>
    %82 = vector.broadcast %79 : vector<8x1xi1> to vector<8x8xi1>
    %83 = vector.broadcast %81 : vector<1x8xi1> to vector<8x8xi1>
    %84 = arith.andi %82, %83 : vector<8x8xi1>
    %85 = vector.broadcast %63 : vector<8x1xf32> to vector<8x8xf32>
    %86 = vector.broadcast %71 : vector<1x8xf32> to vector<8x8xf32>
    %87 = arith.cmpf oeq, %85, %86 : vector<8x8xf32>
    %88 = arith.andi %84, %87 : vector<8x8xi1>
    %cst_26 = arith.constant 0.000000e+00 : f32
    %89 = vector.shape_cast %77 : vector<1x1xf32> to vector<1x1xf32>
    %90 = vector.broadcast %89 : vector<1x1xf32> to vector<8x8xf32>
    %91 = vector.broadcast %cst_26 : f32 to vector<8x8xf32>
    %92 = arith.select %88, %90, %91 : vector<8x8xi1>, vector<8x8xf32>
    %93 = arith.addf %55, %92 : vector<8x8xf32>
    %c2_i32 = arith.constant 2 : i32
    %94 = vector.broadcast %c2_i32 : i32 to vector<1x3xi32>
    %95 = arith.cmpi eq, %15, %94 : vector<1x3xi32>
    %cst_27 = arith.constant 0.000000e+00 : f32
    %96 = vector.shape_cast %95 : vector<1x3xi1> to vector<1x3xi1>
    %97 = vector.broadcast %96 : vector<1x3xi1> to vector<8x3xi1>
    %98 = vector.broadcast %cst_27 : f32 to vector<8x3xf32>
    %99 = arith.select %97, %1, %98 : vector<8x3xi1>, vector<8x3xf32>
    %cst_28 = arith.constant dense<0.000000e+00> : vector<8xf32>
    %100 = vector.multi_reduction <add>, %99, %cst_28 [1] : vector<8x3xf32> to vector<8xf32>
    %101 = vector.shape_cast %100 : vector<8xf32> to vector<8x1xf32>
    %102 = vector.broadcast %c2_i32 : i32 to vector<3x1xi32>
    %103 = arith.cmpi eq, %16, %102 : vector<3x1xi32>
    %cst_29 = arith.constant 0.000000e+00 : f32
    %104 = vector.shape_cast %103 : vector<3x1xi1> to vector<3x1xi1>
    %105 = vector.broadcast %104 : vector<3x1xi1> to vector<3x8xi1>
    %106 = vector.broadcast %cst_29 : f32 to vector<3x8xf32>
    %107 = arith.select %105, %2, %106 : vector<3x8xi1>, vector<3x8xf32>
    %cst_30 = arith.constant dense<0.000000e+00> : vector<8xf32>
    %108 = vector.multi_reduction <add>, %107, %cst_30 [0] : vector<3x8xf32> to vector<8xf32>
    %109 = vector.shape_cast %108 : vector<8xf32> to vector<1x8xf32>
    %110 = vector.broadcast %c2_i32 : i32 to vector<1x3xi32>
    %111 = arith.cmpi eq, %15, %110 : vector<1x3xi32>
    %cst_31 = arith.constant 0.000000e+00 : f32
    %112 = vector.broadcast %cst_31 : f32 to vector<1x3xf32>
    %113 = arith.select %111, %14, %112 : vector<1x3xi1>, vector<1x3xf32>
    %cst_32 = arith.constant dense<0.000000e+00> : vector<1xf32>
    %114 = vector.multi_reduction <add>, %113, %cst_32 [1] : vector<1x3xf32> to vector<1xf32>
    %115 = vector.shape_cast %114 : vector<1xf32> to vector<1x1xf32>
    %cst_33 = arith.constant -1.000000e+00 : f32
    %116 = vector.broadcast %cst_33 : f32 to vector<8x1xf32>
    %117 = arith.cmpf one, %101, %116 : vector<8x1xf32>
    %cst_34 = arith.constant -1.000000e+00 : f32
    %118 = vector.broadcast %cst_34 : f32 to vector<1x8xf32>
    %119 = arith.cmpf one, %109, %118 : vector<1x8xf32>
    %120 = vector.broadcast %117 : vector<8x1xi1> to vector<8x8xi1>
    %121 = vector.broadcast %119 : vector<1x8xi1> to vector<8x8xi1>
    %122 = arith.andi %120, %121 : vector<8x8xi1>
    %123 = vector.broadcast %101 : vector<8x1xf32> to vector<8x8xf32>
    %124 = vector.broadcast %109 : vector<1x8xf32> to vector<8x8xf32>
    %125 = arith.cmpf oeq, %123, %124 : vector<8x8xf32>
    %126 = arith.andi %122, %125 : vector<8x8xi1>
    %cst_35 = arith.constant 0.000000e+00 : f32
    %127 = vector.shape_cast %115 : vector<1x1xf32> to vector<1x1xf32>
    %128 = vector.broadcast %127 : vector<1x1xf32> to vector<8x8xf32>
    %129 = vector.broadcast %cst_35 : f32 to vector<8x8xf32>
    %130 = arith.select %126, %128, %129 : vector<8x8xi1>, vector<8x8xf32>
    %131 = arith.addf %93, %130 : vector<8x8xf32>
    %c3_i32 = arith.constant 3 : i32
    %cst_36 = arith.constant 0.333333343 : f32
    %132 = vector.broadcast %cst_36 : f32 to vector<8x8xf32>
    %133 = arith.mulf %131, %132 : vector<8x8xf32>
    %cst_37 = arith.constant 1.000000e+00 : f32
    %134 = vector.broadcast %cst_37 : f32 to vector<8x8xf32>
    %135 = arith.cmpf ogt, %133, %134 : vector<8x8xf32>
    %cst_38 = arith.constant 5.000000e+00 : f32
    %136 = vector.broadcast %cst_38 : f32 to vector<8x8xf32>
    %137 = arith.mulf %133, %136 : vector<8x8xf32>
    %138 = arith.select %135, %137, %133 : vector<8x8xi1>, vector<8x8xf32>
    %cst_39 = arith.constant 1.000000e+00 : f32
    %139 = vector.broadcast %cst_39 : f32 to vector<8x8xf32>
    %140 = arith.cmpf olt, %138, %139 : vector<8x8xf32>
    %cst_40 = arith.constant 2.000000e-01 : f32
    %141 = vector.broadcast %cst_40 : f32 to vector<8x8xf32>
    %142 = arith.mulf %138, %141 : vector<8x8xf32>
    %143 = arith.select %140, %142, %138 : vector<8x8xi1>, vector<8x8xf32>
    %144 = arith.mulf %0, %143 : vector<8x8xf32>
    %c0_41 = arith.constant 0 : index
    %c0_42 = arith.constant 0 : index
    %145 = vector.load %arg3[%c0_41, %c0_42] : memref<8x2xf32, #tpu.memory_space<vmem>>, vector<8x2xf32>
    %c0_43 = arith.constant 0 : index
    %c0_44 = arith.constant 0 : index
    %146 = vector.load %arg4[%c0_43, %c0_44] : memref<2x8xf32, #tpu.memory_space<vmem>>, vector<2x8xf32>
    %cst_45 = arith.constant -1.000000e+00 : f32
    %147 = vector.broadcast %cst_45 : f32 to vector<8x2xf32>
    %148 = arith.cmpf one, %145, %147 : vector<8x2xf32>
    %149 = arith.extui %148 : vector<8x2xi1> to vector<8x2xi32>
    %150 = arith.sitofp %149 : vector<8x2xi32> to vector<8x2xf32>
    %cst_46 = arith.constant dense<0.000000e+00> : vector<2xf32>
    %151 = vector.multi_reduction <add>, %150, %cst_46 [0] : vector<8x2xf32> to vector<2xf32>
    %152 = vector.shape_cast %151 : vector<2xf32> to vector<1x2xf32>
    %cst_47 = arith.constant 1.000000e+00 : f32
    %153 = vector.broadcast %cst_47 : f32 to vector<1x2xf32>
    %154 = arith.cmpf ogt, %152, %153 : vector<1x2xf32>
    %cst_48 = arith.constant 1.250000e-01 : f32
    %155 = vector.broadcast %cst_48 : f32 to vector<1x2xf32>
    %156 = arith.mulf %152, %155 : vector<1x2xf32>
    %cst_49 = arith.constant 0.000000e+00 : f32
    %157 = vector.broadcast %cst_49 : f32 to vector<1x2xf32>
    %158 = arith.select %154, %156, %157 : vector<1x2xi1>, vector<1x2xf32>
    %cst_50 = arith.constant 1.000000e+00 : f32
    %159 = vector.broadcast %cst_50 : f32 to vector<1x2xf32>
    %160 = arith.maximumf %152, %159 : vector<1x2xf32>
    %cst_51 = arith.constant 0.000000e+00 : f32
    %161 = vector.broadcast %cst_51 : f32 to vector<8x2xf32>
    %162 = arith.select %148, %145, %161 : vector<8x2xi1>, vector<8x2xf32>
    %cst_52 = arith.constant dense<0.000000e+00> : vector<2xf32>
    %163 = vector.multi_reduction <add>, %162, %cst_52 [0] : vector<8x2xf32> to vector<2xf32>
    %164 = vector.shape_cast %163 : vector<2xf32> to vector<1x2xf32>
    %165 = arith.divf %164, %160 : vector<1x2xf32>
    %166 = vector.broadcast %165 : vector<1x2xf32> to vector<8x2xf32>
    %167 = arith.subf %145, %166 : vector<8x2xf32>
    %168 = arith.mulf %167, %167 : vector<8x2xf32>
    %cst_53 = arith.constant 0.000000e+00 : f32
    %169 = vector.broadcast %cst_53 : f32 to vector<8x2xf32>
    %170 = arith.select %148, %168, %169 : vector<8x2xi1>, vector<8x2xf32>
    %cst_54 = arith.constant dense<0.000000e+00> : vector<2xf32>
    %171 = vector.multi_reduction <add>, %170, %cst_54 [0] : vector<8x2xf32> to vector<2xf32>
    %172 = vector.shape_cast %171 : vector<2xf32> to vector<1x2xf32>
    %cst_55 = arith.constant 1.000000e+00 : f32
    %173 = vector.broadcast %cst_55 : f32 to vector<1x2xf32>
    %174 = arith.subf %152, %173 : vector<1x2xf32>
    %cst_56 = arith.constant 1.000000e+00 : f32
    %175 = vector.broadcast %cst_56 : f32 to vector<1x2xf32>
    %176 = arith.maximumf %174, %175 : vector<1x2xf32>
    %177 = arith.divf %172, %176 : vector<1x2xf32>
    %178 = math.sqrt %177 : vector<1x2xf32>
    %cst_57 = arith.constant 9.99999997E-7 : f32
    %179 = vector.broadcast %cst_57 : f32 to vector<1x2xf32>
    %180 = arith.addf %178, %179 : vector<1x2xf32>
    %cst_58 = arith.constant 1.000000e+00 : f32
    %181 = vector.broadcast %cst_58 : f32 to vector<1x2xf32>
    %182 = arith.divf %181, %180 : vector<1x2xf32>
    %183 = tpu.iota {dimensions = array<i32: 1>} : vector<1x2xi32>
    %184 = tpu.iota {dimensions = array<i32: 0>} : vector<2x1xi32>
    %185 = tpu.iota {dimensions = array<i32: 0>} : vector<8x8xi32>
    %186 = tpu.iota {dimensions = array<i32: 1>} : vector<8x8xi32>
    %187 = arith.cmpi ne, %185, %186 : vector<8x8xi32>
    %cst_59 = arith.constant 1.000000e+00 : f32
    %188 = vector.broadcast %cst_59 : f32 to vector<8x8xf32>
    %c0_i32_60 = arith.constant 0 : i32
    %189 = vector.broadcast %c0_i32_60 : i32 to vector<1x2xi32>
    %190 = arith.cmpi eq, %183, %189 : vector<1x2xi32>
    %cst_61 = arith.constant 0.000000e+00 : f32
    %191 = vector.shape_cast %190 : vector<1x2xi1> to vector<1x2xi1>
    %192 = vector.broadcast %191 : vector<1x2xi1> to vector<8x2xi1>
    %193 = vector.broadcast %cst_61 : f32 to vector<8x2xf32>
    %194 = arith.select %192, %145, %193 : vector<8x2xi1>, vector<8x2xf32>
    %cst_62 = arith.constant dense<0.000000e+00> : vector<8xf32>
    %195 = vector.multi_reduction <add>, %194, %cst_62 [1] : vector<8x2xf32> to vector<8xf32>
    %196 = vector.shape_cast %195 : vector<8xf32> to vector<8x1xf32>
    %197 = vector.broadcast %c0_i32_60 : i32 to vector<2x1xi32>
    %198 = arith.cmpi eq, %184, %197 : vector<2x1xi32>
    %cst_63 = arith.constant 0.000000e+00 : f32
    %199 = vector.shape_cast %198 : vector<2x1xi1> to vector<2x1xi1>
    %200 = vector.broadcast %199 : vector<2x1xi1> to vector<2x8xi1>
    %201 = vector.broadcast %cst_63 : f32 to vector<2x8xf32>
    %202 = arith.select %200, %146, %201 : vector<2x8xi1>, vector<2x8xf32>
    %cst_64 = arith.constant dense<0.000000e+00> : vector<8xf32>
    %203 = vector.multi_reduction <add>, %202, %cst_64 [0] : vector<2x8xf32> to vector<8xf32>
    %204 = vector.shape_cast %203 : vector<8xf32> to vector<1x8xf32>
    %205 = vector.broadcast %c0_i32_60 : i32 to vector<1x2xi32>
    %206 = arith.cmpi eq, %183, %205 : vector<1x2xi32>
    %cst_65 = arith.constant 0.000000e+00 : f32
    %207 = vector.broadcast %cst_65 : f32 to vector<1x2xf32>
    %208 = arith.select %206, %165, %207 : vector<1x2xi1>, vector<1x2xf32>
    %cst_66 = arith.constant dense<0.000000e+00> : vector<1xf32>
    %209 = vector.multi_reduction <add>, %208, %cst_66 [1] : vector<1x2xf32> to vector<1xf32>
    %210 = vector.shape_cast %209 : vector<1xf32> to vector<1x1xf32>
    %211 = vector.broadcast %c0_i32_60 : i32 to vector<1x2xi32>
    %212 = arith.cmpi eq, %183, %211 : vector<1x2xi32>
    %cst_67 = arith.constant 0.000000e+00 : f32
    %213 = vector.broadcast %cst_67 : f32 to vector<1x2xf32>
    %214 = arith.select %212, %182, %213 : vector<1x2xi1>, vector<1x2xf32>
    %cst_68 = arith.constant dense<0.000000e+00> : vector<1xf32>
    %215 = vector.multi_reduction <add>, %214, %cst_68 [1] : vector<1x2xf32> to vector<1xf32>
    %216 = vector.shape_cast %215 : vector<1xf32> to vector<1x1xf32>
    %217 = vector.broadcast %c0_i32_60 : i32 to vector<1x2xi32>
    %218 = arith.cmpi eq, %183, %217 : vector<1x2xi32>
    %cst_69 = arith.constant 0.000000e+00 : f32
    %219 = vector.broadcast %cst_69 : f32 to vector<1x2xf32>
    %220 = arith.select %218, %158, %219 : vector<1x2xi1>, vector<1x2xf32>
    %cst_70 = arith.constant dense<0.000000e+00> : vector<1xf32>
    %221 = vector.multi_reduction <add>, %220, %cst_70 [1] : vector<1x2xf32> to vector<1xf32>
    %222 = vector.shape_cast %221 : vector<1xf32> to vector<1x1xf32>
    %223 = vector.broadcast %210 : vector<1x1xf32> to vector<8x1xf32>
    %224 = arith.subf %196, %223 : vector<8x1xf32>
    %225 = vector.broadcast %216 : vector<1x1xf32> to vector<8x1xf32>
    %226 = arith.mulf %224, %225 : vector<8x1xf32>
    %227 = vector.broadcast %210 : vector<1x1xf32> to vector<1x8xf32>
    %228 = arith.subf %204, %227 : vector<1x8xf32>
    %229 = vector.broadcast %216 : vector<1x1xf32> to vector<1x8xf32>
    %230 = arith.mulf %228, %229 : vector<1x8xf32>
    %cst_71 = arith.constant -1.000000e+00 : f32
    %231 = vector.broadcast %cst_71 : f32 to vector<8x1xf32>
    %232 = arith.cmpf one, %196, %231 : vector<8x1xf32>
    %cst_72 = arith.constant -1.000000e+00 : f32
    %233 = vector.broadcast %cst_72 : f32 to vector<1x8xf32>
    %234 = arith.cmpf one, %204, %233 : vector<1x8xf32>
    %235 = vector.broadcast %232 : vector<8x1xi1> to vector<8x8xi1>
    %236 = vector.broadcast %234 : vector<1x8xi1> to vector<8x8xi1>
    %237 = arith.andi %235, %236 : vector<8x8xi1>
    %238 = arith.andi %237, %187 : vector<8x8xi1>
    %239 = vector.broadcast %226 : vector<8x1xf32> to vector<8x8xf32>
    %240 = vector.broadcast %230 : vector<1x8xf32> to vector<8x8xf32>
    %241 = arith.subf %239, %240 : vector<8x8xf32>
    %242 = arith.mulf %241, %241 : vector<8x8xf32>
    %cst_73 = arith.constant 0.000000e+00 : f32
    %243 = vector.broadcast %cst_73 : f32 to vector<8x8xf32>
    %244 = arith.select %238, %242, %243 : vector<8x8xi1>, vector<8x8xf32>
    %cst_74 = arith.constant -5.000000e-01 : f32
    %245 = vector.broadcast %cst_74 : f32 to vector<8x8xf32>
    %246 = arith.mulf %244, %245 : vector<8x8xf32>
    %247 = math.exp %246 : vector<8x8xf32>
    %248 = vector.broadcast %222 : vector<1x1xf32> to vector<8x8xf32>
    %249 = arith.mulf %247, %248 : vector<8x8xf32>
    %250 = arith.addf %188, %249 : vector<8x8xf32>
    %c1_i32_75 = arith.constant 1 : i32
    %251 = vector.broadcast %c1_i32_75 : i32 to vector<1x2xi32>
    %252 = arith.cmpi eq, %183, %251 : vector<1x2xi32>
    %cst_76 = arith.constant 0.000000e+00 : f32
    %253 = vector.shape_cast %252 : vector<1x2xi1> to vector<1x2xi1>
    %254 = vector.broadcast %253 : vector<1x2xi1> to vector<8x2xi1>
    %255 = vector.broadcast %cst_76 : f32 to vector<8x2xf32>
    %256 = arith.select %254, %145, %255 : vector<8x2xi1>, vector<8x2xf32>
    %cst_77 = arith.constant dense<0.000000e+00> : vector<8xf32>
    %257 = vector.multi_reduction <add>, %256, %cst_77 [1] : vector<8x2xf32> to vector<8xf32>
    %258 = vector.shape_cast %257 : vector<8xf32> to vector<8x1xf32>
    %259 = vector.broadcast %c1_i32_75 : i32 to vector<2x1xi32>
    %260 = arith.cmpi eq, %184, %259 : vector<2x1xi32>
    %cst_78 = arith.constant 0.000000e+00 : f32
    %261 = vector.shape_cast %260 : vector<2x1xi1> to vector<2x1xi1>
    %262 = vector.broadcast %261 : vector<2x1xi1> to vector<2x8xi1>
    %263 = vector.broadcast %cst_78 : f32 to vector<2x8xf32>
    %264 = arith.select %262, %146, %263 : vector<2x8xi1>, vector<2x8xf32>
    %cst_79 = arith.constant dense<0.000000e+00> : vector<8xf32>
    %265 = vector.multi_reduction <add>, %264, %cst_79 [0] : vector<2x8xf32> to vector<8xf32>
    %266 = vector.shape_cast %265 : vector<8xf32> to vector<1x8xf32>
    %267 = vector.broadcast %c1_i32_75 : i32 to vector<1x2xi32>
    %268 = arith.cmpi eq, %183, %267 : vector<1x2xi32>
    %cst_80 = arith.constant 0.000000e+00 : f32
    %269 = vector.broadcast %cst_80 : f32 to vector<1x2xf32>
    %270 = arith.select %268, %165, %269 : vector<1x2xi1>, vector<1x2xf32>
    %cst_81 = arith.constant dense<0.000000e+00> : vector<1xf32>
    %271 = vector.multi_reduction <add>, %270, %cst_81 [1] : vector<1x2xf32> to vector<1xf32>
    %272 = vector.shape_cast %271 : vector<1xf32> to vector<1x1xf32>
    %273 = vector.broadcast %c1_i32_75 : i32 to vector<1x2xi32>
    %274 = arith.cmpi eq, %183, %273 : vector<1x2xi32>
    %cst_82 = arith.constant 0.000000e+00 : f32
    %275 = vector.broadcast %cst_82 : f32 to vector<1x2xf32>
    %276 = arith.select %274, %182, %275 : vector<1x2xi1>, vector<1x2xf32>
    %cst_83 = arith.constant dense<0.000000e+00> : vector<1xf32>
    %277 = vector.multi_reduction <add>, %276, %cst_83 [1] : vector<1x2xf32> to vector<1xf32>
    %278 = vector.shape_cast %277 : vector<1xf32> to vector<1x1xf32>
    %279 = vector.broadcast %c1_i32_75 : i32 to vector<1x2xi32>
    %280 = arith.cmpi eq, %183, %279 : vector<1x2xi32>
    %cst_84 = arith.constant 0.000000e+00 : f32
    %281 = vector.broadcast %cst_84 : f32 to vector<1x2xf32>
    %282 = arith.select %280, %158, %281 : vector<1x2xi1>, vector<1x2xf32>
    %cst_85 = arith.constant dense<0.000000e+00> : vector<1xf32>
    %283 = vector.multi_reduction <add>, %282, %cst_85 [1] : vector<1x2xf32> to vector<1xf32>
    %284 = vector.shape_cast %283 : vector<1xf32> to vector<1x1xf32>
    %285 = vector.broadcast %272 : vector<1x1xf32> to vector<8x1xf32>
    %286 = arith.subf %258, %285 : vector<8x1xf32>
    %287 = vector.broadcast %278 : vector<1x1xf32> to vector<8x1xf32>
    %288 = arith.mulf %286, %287 : vector<8x1xf32>
    %289 = vector.broadcast %272 : vector<1x1xf32> to vector<1x8xf32>
    %290 = arith.subf %266, %289 : vector<1x8xf32>
    %291 = vector.broadcast %278 : vector<1x1xf32> to vector<1x8xf32>
    %292 = arith.mulf %290, %291 : vector<1x8xf32>
    %cst_86 = arith.constant -1.000000e+00 : f32
    %293 = vector.broadcast %cst_86 : f32 to vector<8x1xf32>
    %294 = arith.cmpf one, %258, %293 : vector<8x1xf32>
    %cst_87 = arith.constant -1.000000e+00 : f32
    %295 = vector.broadcast %cst_87 : f32 to vector<1x8xf32>
    %296 = arith.cmpf one, %266, %295 : vector<1x8xf32>
    %297 = vector.broadcast %294 : vector<8x1xi1> to vector<8x8xi1>
    %298 = vector.broadcast %296 : vector<1x8xi1> to vector<8x8xi1>
    %299 = arith.andi %297, %298 : vector<8x8xi1>
    %300 = arith.andi %299, %187 : vector<8x8xi1>
    %301 = vector.broadcast %288 : vector<8x1xf32> to vector<8x8xf32>
    %302 = vector.broadcast %292 : vector<1x8xf32> to vector<8x8xf32>
    %303 = arith.subf %301, %302 : vector<8x8xf32>
    %304 = arith.mulf %303, %303 : vector<8x8xf32>
    %cst_88 = arith.constant 0.000000e+00 : f32
    %305 = vector.broadcast %cst_88 : f32 to vector<8x8xf32>
    %306 = arith.select %300, %304, %305 : vector<8x8xi1>, vector<8x8xf32>
    %cst_89 = arith.constant -5.000000e-01 : f32
    %307 = vector.broadcast %cst_89 : f32 to vector<8x8xf32>
    %308 = arith.mulf %306, %307 : vector<8x8xf32>
    %309 = math.exp %308 : vector<8x8xf32>
    %310 = vector.broadcast %284 : vector<1x1xf32> to vector<8x8xf32>
    %311 = arith.mulf %309, %310 : vector<8x8xf32>
    %312 = arith.addf %250, %311 : vector<8x8xf32>
    %c2_i32_90 = arith.constant 2 : i32
    %cst_91 = arith.constant 5.000000e-01 : f32
    %313 = vector.broadcast %cst_91 : f32 to vector<8x8xf32>
    %314 = arith.mulf %312, %313 : vector<8x8xf32>
    %cst_92 = arith.constant 1.000000e+00 : f32
    %315 = vector.broadcast %cst_92 : f32 to vector<8x8xf32>
    %316 = arith.cmpf ogt, %314, %315 : vector<8x8xf32>
    %cst_93 = arith.constant 5.000000e+00 : f32
    %317 = vector.broadcast %cst_93 : f32 to vector<8x8xf32>
    %318 = arith.mulf %314, %317 : vector<8x8xf32>
    %319 = arith.select %316, %318, %314 : vector<8x8xi1>, vector<8x8xf32>
    %cst_94 = arith.constant 1.000000e+00 : f32
    %320 = vector.broadcast %cst_94 : f32 to vector<8x8xf32>
    %321 = arith.cmpf olt, %319, %320 : vector<8x8xf32>
    %cst_95 = arith.constant 2.000000e-01 : f32
    %322 = vector.broadcast %cst_95 : f32 to vector<8x8xf32>
    %323 = arith.mulf %319, %322 : vector<8x8xf32>
    %324 = arith.select %321, %323, %319 : vector<8x8xi1>, vector<8x8xf32>
    %325 = arith.mulf %144, %324 : vector<8x8xf32>
    %c0_96 = arith.constant 0 : index
    %c0_97 = arith.constant 0 : index
    %326 = vector.load %arg5[%c0_96, %c0_97] : memref<8x8xf32, #tpu.memory_space<vmem>>, vector<8x8xf32>
    tpu.vector_store %arg5[%c0_96, %c0_97], %325 {strides = array<i32>} : memref<8x8xf32, #tpu.memory_space<vmem>>, vector<8x8xf32>,
    return
  }
  func.func @transform_0(%arg0: i32) -> (i32, i32) {
    %c0_i32 = arith.constant 0 : i32
    %c0_i32_0 = arith.constant 0 : i32
    %c0_i32_1 = arith.constant 0 : i32
    return %c0_i32, %c0_i32_0 : i32, i32
  }
  func.func @transform_1(%arg0: i32) -> (i32, i32) {
    %c0_i32 = arith.constant 0 : i32
    %c0_i32_0 = arith.constant 0 : i32
    %c0_i32_1 = arith.constant 0 : i32
    return %c0_i32, %c0_i32_0 : i32, i32
  }
  func.func @transform_2(%arg0: i32) -> (i32, i32) {
    %c0_i32 = arith.constant 0 : i32
    %c0_i32_0 = arith.constant 0 : i32
    %c0_i32_1 = arith.constant 0 : i32
    return %c0_i32, %c0_i32_0 : i32, i32
  }
  func.func @transform_3(%arg0: i32) -> (i32, i32) {
    %c0_i32 = arith.constant 0 : i32
    %c0_i32_0 = arith.constant 0 : i32
    %c0_i32_1 = arith.constant 0 : i32
    return %c0_i32, %c0_i32_0 : i32, i32
  }
  func.func @transform_4(%arg0: i32) -> (i32, i32) {
    %c0_i32 = arith.constant 0 : i32
    %c0_i32_0 = arith.constant 0 : i32
    %c0_i32_1 = arith.constant 0 : i32
    return %c0_i32, %c0_i32_0 : i32, i32
  }
}

</mosaic_0001>

<bundles_post_ra>
// kernel: tpu_custom_call.1
= control target key start
LH: loop header
LB: loop body
LE: loop exit
PB: predicated region body
PF: predicated region fallthrough
CT: control target
= control target key end

     0   :  { %v34_v0 = vlaneseq  ;;  %vm150_vm0 = vcmask 15360   ;;  %vm23_vm1 = vcmask 23552   ;;  %v351_v5 = vmov 0.0   ;;  %s522_s0 = inlined_call_operand.vmem [shape: f32[8,3], index: 0, kind: input, shape index: {}]   ;;  %s523_s1 = inlined_call_operand.vmem [shape: f32[3,8], index: 1, kind: input, shape index: {}]   ;;  %s524_s2 = inlined_call_operand.vmem [shape: f32[8,2], index: 2, kind: input, shape index: {}]   ;;  %s525_s3 = inlined_call_operand.vmem [shape: f32[2,8], index: 3, kind: input, shape index: {}]   ;;  %s526_s4 = inlined_call_operand.hbm [shape: f32[8,8], index: 4, kind: output, shape index: {}]  }
   0x1   :  { %v381_v1 = vld [vmem:[%s524_s2] sm:$0xff] }
   0x2   :  { %v386_v2 = vld [vmem:[%s522_s0] sm:$0xff]  ;;  %vm147_vm2 = vcmp.ne.f32.partialorder %v381_v1, -1.0  ;;  %v390_v3 = vand.u32 127, %v34_v0 }
   0x3   :  { %vm20_vm3 = vcmp.ne.f32.partialorder %v386_v2, -1.0  ;;  %v162_v4 = vsel %vm147_vm2, %v381_v1, 0.0  ;;  %v311_v6 = vsel %vm147_vm2, 1.0, %v351_v5 }
   0x4   :  { %v310_v7 = vsel %vm20_vm3, 1.0, %v351_v5 }
   0x5   :  { %9 = vsyncpa [#allocation3], 0  ;;  %v151_v8 = vsel %vm150_vm0, %v311_v6, 0.0  ;;  %v163_v9 = vsel %vm150_vm0, %v162_v4, 0.0  ;;  %v24_v10 = vsel %vm23_vm1, %v310_v7, 0.0  ;;  %vm38_vm4 = vcmp.eq.s32.totalorder %v390_v3, 0 }
   0x6   :  { %v152_v11 = vrot.slane %v151_v8, 4  ;;  %vm72_vm5 = vcmp.eq.s32.totalorder %v390_v3, 1  ;;  %v197_v12 = vsel %vm38_vm4, %v381_v1, 0.0  ;;  %v164_v13 = vrot.slane %v163_v9, 4 }
   0x7   :  { %v242_v14 = vsel %vm72_vm5, %v381_v1, 0.0  ;;  %v25_v15 = vrot.slane %v24_v10, 4  ;;  %v198_v16 = vsel %vm150_vm0, %v197_v12, 0.0  ;;  %vm105_vm6 = vcmp.eq.s32.totalorder %v390_v3, 2 }
   0x8   :  { %v153_v17 = vadd.f32 %v152_v11, %v151_v8  ;;  %v243_v18 = vsel %vm150_vm0, %v242_v14, 0.0  ;;  %199 = vadd.xlane.f32.xlu0 %v198_v16  ;;  %v411_v20 = vshrl.u32 %v34_v0, 7  ;;  %v108_v22 = vsel %vm105_vm6, %v386_v2, 0.0 }
   0x9   :  { %244 = vadd.xlane.f32.xlu1 %v243_v18  ;;  %v26_v19 = vadd.f32 %v25_v15, %v24_v10  ;;  %v165_v23 = vadd.f32 %v164_v13, %v163_v9  ;;  %v417_v24 = vsel %vm23_vm1, %v108_v22, 0.0  ;;  %v41_v52 = vsel %vm38_vm4, %v386_v2, 0.0 }
   0xa   :  { %v154_v21 = vrot.slane %v153_v17, 2  ;;  %vm196_vm7 = vcmp.ne.s32.totalorder %v411_v20, %v390_v3  ;;  %v42_v56 = vsel %vm23_vm1, %v41_v52, 0.0  ;;  %vm45_vm12 = vcmp.eq.s32.totalorder %v411_v20, 0 }
   0xb   :  { %v27_v25 = vrot.slane %v26_v19, 2  ;;  %v166_v29 = vrot.slane %v165_v23, 2  ;;  %vm79_vm13 = vcmp.eq.s32.totalorder %v411_v20, 1  ;;  %vm202_vm14 = vcmask 58368  }
   0xc   :  { %v155_v26 = vadd.f32 %v154_v21, %v153_v17  ;;  %v75_v21 = vsel %vm72_vm5, %v386_v2, 0.0  ;;  %v146_v2 = vld [vmem:[%s525_s3] sm:$0x3] }
   0xd   :  { %v28_v27 = vadd.f32 %v27_v25, %v26_v19  ;;  %v167_v34 = vadd.f32 %v166_v29, %v165_v23  ;;  %v76_v22 = vsel %vm23_vm1, %v75_v21, 0.0 }
   0xe   :  { %v156_v28 = vrot.slane %v155_v26, 1 }
   0xf   :  { %v29_v30 = vrot.slane %v28_v27, 1  ;;  %v168_v38 = vrot.slane %v167_v34, 1 }
  0x10   :  { %v157_v31 = vadd.f32 %v156_v28, %v155_v26  ;;  %v201_v26 = vsel %vm45_vm12, %v146_v2, 0.0 }
  0x11   :  { %v30_v32 = vadd.f32 %v29_v30, %v28_v27  ;;  %v169_v40 = vadd.f32 %v168_v38, %v167_v34  ;;  %v203_v27 = vsel %vm202_vm14, %v201_v26, 0.0 }
  0x12   :  { %v161_v33 = vmax.f32 %v157_v31, 1.0  ;;  %v312_v42 = vadd.f32 -1.0, %v157_v31  ;;  %v159_v54 = vmul.f32 0.125, %v157_v31  ;;  %vm158_vm9 = vcmp.gt.f32.partialorder %v157_v31, 1.0 }
  0x13   :  { %vm31_vm8 = vcmp.gt.f32.partialorder %v30_v32, 1.0  ;;  %v32_v35 = vmul.f32 0.125, %v30_v32  ;;  %v204_v29 = vrot.slane %v203_v27, 4 }
  0x14   :  { %315 = vrcp.f32 %v161_v33  ;;  %v183_v47 = vmax.f32 %v312_v42, 1.0  ;;  %v160_v59 = vsel %vm158_vm9, %v159_v54, 0.0  ;;  %vm112_vm9 = vcmp.eq.s32.totalorder %v411_v20, 2 }
  0x15   :  { %v421_v36 = vsel %vm31_vm8, %v32_v35, 0.0  ;;  %v218_v63 = vsel %vm38_vm4, %v160_v59, 0.0  ;;  %v262_v6 = vsel %vm72_vm5, %v160_v59, 0.0  ;;  %v205_v31 = vadd.f32 %v204_v29, %v203_v27 }
  0x16   :  { %v123_v37 = vsel %vm105_vm6, %v421_v36, 0.0  ;;  %317 = vrcp.f32 %v183_v47  ;;  %v57_v58 = vsel %vm38_vm4, %v421_v36, 0.0  ;;  %v219_v4 = vsel %vm150_vm0, %v218_v63, 0.0 }
  0x17   :  { %v427_v39 = vsel %vm23_vm1, %v123_v37, 0.0  ;;  %v58_v61 = vsel %vm23_vm1, %v57_v58, 0.0  ;;  %v263_v8 = vsel %vm150_vm0, %v262_v6, 0.0  ;;  %v90_v23 = vsel %vm72_vm5, %v421_v36, 0.0 }
  0x18   :  { %v91_v25 = vsel %vm23_vm1, %v90_v23, 0.0  ;;  %v206_v33 = vrot.slane %v205_v31, 2  ;;  %vm49_vm8 = vcmask 59392  }
  0x1a   :  { %v207_v35 = vadd.f32 %v206_v33, %v205_v31 }
  0x1c   :  { %v208_v37 = vrot.slane %v207_v35, 1 }
  0x1e   :  { %v316_v41 = vpop.eup %315 }
  0x1f   :  { %v171_v43 = vmul.f32 %v316_v41, %v169_v40 }
  0x21   :  { %v210_v44 = vsel %vm38_vm4, %v171_v43, 0.0  ;;  %v172_v45 = vsub.f32 %v381_v1, %v171_v43  ;;  %v254_v46 = vsel %vm72_vm5, %v171_v43, 0.0  ;;  %v318_v1 = vpop.eup %317 }
  0x22   :  { %v211_v48 = vsel %vm150_vm0, %v210_v44, 0.0  ;;  %v255_v50 = vsel %vm150_vm0, %v254_v46, 0.0 }
  0x23   :  { %212 = vadd.xlane.f32.xlu0 %v211_v48  ;;  %v173_v49 = vmul.f32 %v172_v45, %v172_v45  ;;  %v19_v45 = vld [vmem:[%s523_s1] sm:$0x7]  ;;  %s352_s1 = smov [#allocation2]  }
  0x24   :  { %v48_v46 = vsel %vm45_vm12, %v19_v45, 0.0  ;;  %v82_v48 = vsel %vm79_vm13, %v19_v45, 0.0  ;;  %s302_s20 = sshll.u32 %s352_s1, 4  ;;  %s303_s20 = int_to_ptr.vmem [resolvable:$true] %s302_s20 }
  0x25   :  { %v174_v51 = vsel %vm147_vm2, %v173_v49, 0.0  ;;  %v50_v47 = vsel %vm49_vm8, %v48_v46, 0.0  ;;  %v83_v3 = vsel %vm49_vm8, %v82_v48, 0.0  ;;  %s327_s21 = scalar_lea.vmem %s303_s20, 128  ;;  %p332_p1 = scmp.lt.s32.totalorder %s303_s20, %s303_s20 }
  0x26   :  { %v175_v53 = vsel %vm150_vm0, %v174_v51, 0.0  ;;  %v51_v49 = vrot.slane %v50_v47, 4  ;;  %v115_v51 = vsel %vm112_vm9, %v19_v45, 0.0  ;;  %v84_v52 = vrot.slane %v83_v3, 4  ;;  %p328_p0 = scmp.ne.s32.totalorder %s303_s20, %s327_s21  ;;  %p333_p2 = scmp.lt.s32.totalorder %s327_s21, %s327_s21 }
  0x27   :  { %v176_v55 = vrot.slane %v175_v53, 4  ;;  %256 = vadd.xlane.f32.xlu0 %v255_v50 }
  0x28   :  { %v52_v50 = vadd.f32 %v51_v49, %v50_v47  ;;  %p334_p3 = por %p333_p2, %p332_p1 }
  0x29   :  { %v177_v57 = vadd.f32 %v176_v55, %v175_v53  ;;  %v116_v53 = vsel %vm49_vm8, %v115_v51, 0.0  ;;  %v85_v55 = vadd.f32 %v84_v52, %v83_v3 }
  0x2a   :  { %v53_v54 = vrot.slane %v52_v50, 2  ;;  %p335_p4 = pnand %p334_p3, %p328_p0 }
  0x2b   :  { %v178_v60 = vrot.slane %v177_v57, 2  ;;  %43 = vadd.xlane.f32.xlu0 %v42_v56  ;;  %v117_v56 = vrot.slane %v116_v53, 4  ;;  %v86_v59 = vrot.slane %v85_v55, 2 }
  0x2c   :  { %v54_v58 = vadd.f32 %v53_v54, %v52_v50 }
  0x2d   :  { %v179_v62 = vadd.f32 %v178_v60, %v177_v57  ;;  %v118_v60 = vadd.f32 %v117_v56, %v116_v53  ;;  %v87_v63 = vadd.f32 %v86_v59, %v85_v55 }
  0x2f   :  { %v180_v0 = vrot.slane %v179_v62, 1  ;;  %59 = vadd.xlane.f32.xlu0 %v58_v61  ;;  %v55_v61 = vrot.slane %v54_v58, 1 }
  0x31   :  { %v181_v5 = vadd.f32 %v180_v0, %v179_v62  ;;  %v119_v0 = vrot.slane %v118_v60, 2 }
  0x33   :  { %v185_v7 = vmul.f32 %v318_v1, %v181_v5  ;;  %220 = vadd.xlane.f32.xlu0 %v219_v4  ;;  %v56_v4 = vadd.f32 %v55_v61, %v54_v58 }
  0x35   :  { %319 = vrsqrt.f32 %v185_v7  ;;  %vm188_vm10 = vcmp.eq.f32.partialorder %v185_v7, inf  ;;  %v191_v10 = vand.u32 2147483648, %v185_v7  ;;  %vm190_vm11 = vcmp.eq.f32.partialorder %v185_v7, 0.0 }
  0x37   :  { %264 = vadd.xlane.f32.xlu0 %v263_v8  ;;  %v120_v8 = vadd.f32 %v119_v0, %v118_v60 }
  0x3f   :  { %v320_v9 = vpop.eup %319 }
  0x40   :  { %v187_v11 = vmul.f32 %v320_v9, %v185_v7 }
  0x42   :  { %v189_v12 = vsel %vm188_vm10, %v185_v7, %v187_v11  ;;  %v88_v7 = vrot.slane %v87_v63, 1  ;;  %vm62_vm10 = vcmp.ne.f32.partialorder %v56_v4, -1.0 }
  0x43   :  { %v192_v13 = vsel %vm190_vm11, %v191_v10, %v189_v12 }
  0x44   :  { %v193_v14 = vadd.f32 1e-06, %v192_v13 }
  0x46   :  { %321 = vrcp.f32 %v193_v14 }
  0x50   :  { %v322_v15 = vpop.eup %321 }
  0x51   :  { %v214_v16 = vsel %vm38_vm4, %v322_v15, 0.0  ;;  %v258_v17 = vsel %vm72_vm5, %v322_v15, 0.0  ;;  %v89_v15 = vadd.f32 %v88_v7, %v87_v63 }
  0x52   :  { %v215_v18 = vsel %vm150_vm0, %v214_v16, 0.0  ;;  %v259_v19 = vsel %vm150_vm0, %v258_v17, 0.0  ;;  %v121_v16 = vrot.slane %v120_v8, 1 }
  0x53   :  { %216 = vadd.xlane.f32.xlu1 %v215_v18 }
  0x57   :  { %260 = vadd.xlane.f32.xlu1 %v259_v19 }
  0x5b   :  { %77 = vadd.xlane.f32.xlu1 %v76_v22 }
  0x5f   :  { %110 = vadd.xlane.f32.xlu1 %v417_v24  ;;  %v246_v24 = vsel %vm79_vm13, %v146_v2, 0.0  ;;  %v122_v2 = vadd.f32 %v121_v16, %v120_v8 }
  0x60   :  { %v247_v28 = vsel %vm202_vm14, %v246_v24, 0.0  ;;  %vm95_vm14 = vcmp.ne.f32.partialorder %v89_v15, -1.0 }
  0x61   :  { %v248_v30 = vrot.slane %v247_v28, 4 }
  0x63   :  { %92 = vadd.xlane.f32.xlu1 %v91_v25  ;;  %v249_v32 = vadd.f32 %v248_v30, %v247_v28 }
  0x65   :  { %v250_v34 = vrot.slane %v249_v32, 2 }
  0x67   :  { %125 = vadd.xlane.f32.xlu1 %v427_v39  ;;  %v251_v36 = vadd.f32 %v250_v34, %v249_v32  ;;  %v209_v39 = vadd.f32 %v208_v37, %v207_v35 }
  0x69   :  { %v252_v38 = vrot.slane %v251_v36, 1  ;;  %vm227_vm15 = vcmp.ne.f32.partialorder %v209_v39, -1.0 }
  0x6b   :  { %v253_v40 = vadd.f32 %v252_v38, %v251_v36 }
  0x6d   :  { %vm271_vm1 = vcmp.ne.f32.partialorder %v253_v40, -1.0 }
  0x95   :  { %v200_v41 = vpop.xlane.xlu0 %199 }
  0x96   :  { %v245_v42 = vpop.xlane.xlu1 %244  ;;  %vm226_vm0 = vcmp.ne.f32.partialorder %v200_v41, -1.0 }
  0x97   :  { %vm270_vm2 = vcmp.ne.f32.partialorder %v245_v42, -1.0  ;;  %vm232_vm3 = vmand %vm226_vm0, %vm227_vm15 }
  0x98   :  { %vm481_vm4 = vmand %vm232_vm3, %vm196_vm7 }
  0x99   :  { %vm276_vm5 = vmand %vm270_vm2, %vm271_vm1  ;;  %vm128_vm2 = vcmp.ne.f32.partialorder %v122_v2, -1.0 }
  0x9a   :  { %vm488_vm6 = vmand %vm276_vm5, %vm196_vm7 }
  0xb0   :  { %v213_v57 = vpop.xlane.xlu0 %212 }
  0xb1   :  { %v224_v1 = vsub.f32 %v209_v39, %v213_v57  ;;  %v222_v5 = vsub.f32 %v200_v41, %v213_v57 }
  0xb4   :  { %v257_v62 = vpop.xlane.xlu0 %256 }
  0xb5   :  { %v268_v9 = vsub.f32 %v253_v40, %v257_v62  ;;  %v266_v12 = vsub.f32 %v245_v42, %v257_v62 }
  0xb8   :  { %v44_v20 = vpop.xlane.xlu0 %43 }
  0xb9   :  { %vm61_vm7 = vcmp.ne.f32.partialorder %v44_v20, -1.0  ;;  %vm68_vm11 = vcmp.eq.f32.partialorder %v44_v20, %v56_v4 }
  0xba   :  { %vm67_vm12 = vmand %vm61_vm7, %vm62_vm10 }
  0xbb   :  { %vm502_vm13 = vmand %vm67_vm12, %vm68_vm11  ;;  %vm294_vm12 = vcmask 64512  }
  0xbc   :  { %v60_v24 = vpop.xlane.xlu0 %59 }
  0xbd   :  { %v70_v30 = vsel %vm502_vm13, %v60_v24, 0.0 }
  0xbe   :  { %v71_v34 = vadd.f32 1.0, %v70_v30 }
  0xc0   :  { %v221_v38 = vpop.xlane.xlu0 %220 }
  0xc4   :  { %v265_v45 = vpop.xlane.xlu0 %264 }
  0xe0   :  { %v217_v6 = vpop.xlane.xlu1 %216 }
  0xe1   :  { %v223_v10 = vmul.f32 %v222_v5, %v217_v6  ;;  %v225_v11 = vmul.f32 %v224_v1, %v217_v6 }
  0xe3   :  { %v234_v13 = vsub.f32 %v223_v10, %v225_v11 }
  0xe4   :  { %v261_v14 = vpop.xlane.xlu1 %260 }
  0xe5   :  { %v235_v17 = vmul.f32 %v234_v13, %v234_v13  ;;  %v267_v18 = vmul.f32 %v266_v12, %v261_v14  ;;  %v269_v19 = vmul.f32 %v268_v9, %v261_v14 }
  0xe7   :  { %v236_v21 = vsel %vm481_vm4, %v235_v17, 0.0  ;;  %v278_v22 = vsub.f32 %v267_v18, %v269_v19 }
  0xe8   :  { %v237_v23 = vmul.f32 -0.5, %v236_v21  ;;  %v78_v25 = vpop.xlane.xlu1 %77 }
  0xe9   :  { %v279_v27 = vmul.f32 %v278_v22, %v278_v22  ;;  %vm94_vm15 = vcmp.ne.f32.partialorder %v78_v25, -1.0  ;;  %vm101_vm0 = vcmp.eq.f32.partialorder %v78_v25, %v89_v15 }
  0xea   :  { %v238_v28 = vmul.f32 1.442695, %v237_v23  ;;  %vm100_vm1 = vmand %vm94_vm15, %vm95_vm14 }
  0xeb   :  { %v280_v29 = vsel %vm488_vm6, %v279_v27, 0.0  ;;  %vm102_vm4 = vmand %vm100_vm1, %vm101_vm0 }
  0xec   :  { %323 = vpow2.f32 %v238_v28  ;;  %v281_v31 = vmul.f32 -0.5, %v280_v29  ;;  %v111_v32 = vpop.xlane.xlu1 %110 }
  0xed   :  { %vm127_vm3 = vcmp.ne.f32.partialorder %v111_v32, -1.0  ;;  %vm134_vm5 = vcmp.eq.f32.partialorder %v111_v32, %v122_v2 }
  0xee   :  { %v282_v33 = vmul.f32 1.442695, %v281_v31  ;;  %vm133_vm8 = vmand %vm127_vm3, %vm128_vm2 }
  0xef   :  { %vm135_vm6 = vmand %vm133_vm8, %vm134_vm5 }
  0xf0   :  { %325 = vpow2.f32 %v282_v33  ;;  %v93_v35 = vpop.xlane.xlu1 %92 }
  0xf1   :  { %v103_v36 = vsel %vm102_vm4, %v93_v35, 0.0 }
  0xf2   :  { %v104_v37 = vadd.f32 %v103_v36, %v71_v34 }
  0xf4   :  { %v126_v39 = vpop.xlane.xlu1 %125 }
  0xf5   :  { %v136_v40 = vsel %vm135_vm6, %v126_v39, 0.0 }
  0xf6   :  { %v324_v41 = vpop.eup %323  ;;  %v137_v42 = vadd.f32 %v136_v40, %v104_v37 }
  0xf7   :  { %v240_v43 = vmul.f32 %v324_v41, %v221_v38 }
  0xf8   :  { %v138_v44 = vmul.f32 0.33333334, %v137_v42 }
  0xf9   :  { %v241_v48 = vadd.f32 1.0, %v240_v43 }
  0xfa   :  { %v326_v46 = vpop.eup %325  ;;  %v140_v47 = vmul.f32 5.0, %v138_v44  ;;  %vm139_vm9 = vcmp.gt.f32.partialorder %v138_v44, 1.0 }
  0xfb   :  { %v284_v49 = vmul.f32 %v326_v46, %v265_v45 }
  0xfc   :  { %v141_v50 = vsel %vm139_vm9, %v140_v47, %v138_v44 }
  0xfd   :  { %v285_v3 = vadd.f32 %v284_v49, %v241_v48  ;;  %v143_v53 = vmul.f32 0.2, %v141_v50  ;;  %vm142_vm10 = vcmp.lt.f32.partialorder %v141_v50, 1.0 }
  0xff   :  { %v286_v51 = vmul.f32 0.5, %v285_v3  ;;  %v144_v56 = vsel %vm142_vm10, %v143_v53, %v141_v50 }
 0x101   :  { %vm287_vm7 = vcmp.gt.f32.partialorder %v286_v51, 1.0  ;;  %v288_v52 = vmul.f32 5.0, %v286_v51 }
 0x103   :  { %v289_v54 = vsel %vm287_vm7, %v288_v52, %v286_v51 }
 0x104   :  { %vm290_vm11 = vcmp.lt.f32.partialorder %v289_v54, 1.0  ;;  %v291_v55 = vmul.f32 0.2, %v289_v54 }
 0x106   :  { %v292_v57 = vsel %vm290_vm11, %v291_v55, %v289_v54 }
 0x107   :  { %v293_v58 = vmul.f32 %v292_v57, %v144_v56 }
 0x109   :  { %295 = vst.msk [vmem:[#allocation2] sm:$0xff] %vm294_vm12, %v293_v58 }
 0x10a   :  { %338 = shalt.err (!%p335_p4)
}
 0x10b   :  { %s339_s24 = scalar_lea.hbm %s526_s4, 128 }
 0x10c   :  { %p340_p5 = scmp.ne.s32.totalorder %s526_s4, %s339_s24  ;;  %p343_p6 = scmp.lt.u32.totalorder %s339_s24, %s526_s4 }
 0x10e   :  { %p345_p7 = pnand %p343_p6, %p340_p5 }
 0x110   :  { %348 = shalt.err (!%p345_p7)
}
 0x111   :  { %305 = dma.vmem_to_hbm [thread:$0]  %s303_s20, 128, %s526_s4, [#allocation3]  }
 0x112   :  { %349 = dma.done.wait [#allocation3], 128  }
 0x113   :  { %350 = vsyncadd [#allocation3], 4294967168 }
 0x114   :  { %309 = vsyncpa [#allocation3], 1 }

</bundles_post_ra>
